<compile_context>
chip_gen: v7x
topology: tpu7x:2x2x1
jax: 0.10.0
libtpu: 0.0.40
codegen_flags: <defaults>
</compile_context>

<pallas_src>
import functools
import math

import jax
import jax.numpy as jnp
from jax.experimental import pallas as pl
from jax.experimental.pallas import tpu as pltpu


def _vmem_budgets():
    """Returns (max_block_bytes, vmem_limit_cap) tuned per TPU generation."""
    phys = 128 * 1024 * 1024
    try:
        phys = int(pltpu.get_tpu_info().vmem_capacity_bytes)
    except Exception:
        pass
    if phys <= 64 * 1024 * 1024:
        # v7x-class: only 64 MiB VMEM but 3.2 TB/s HBM -> bigger blocks pay off.
        return 10 * 1024 * 1024, 48 * 1024 * 1024
    # v5e / v6e (128 MiB physical): 4 MiB output blocks already ~86% of roofline.
    return 4 * 1024 * 1024, 64 * 1024 * 1024


def _largest_tile(period, max_elems):
    """Largest divisor of `period` that is a multiple of 128 and <= max_elems."""
    best = 0
    d = 1
    while d * d <= period:
        if period % d == 0:
            for cand in (d, period // d):
                if cand % 128 == 0 and cand <= max_elems and cand > best:
                    best = cand
        d += 1
    return best


def _flat_pad_kernel(x_ref, o_ref, *, n_data_tiles):
    """Flat-view kernel: each tile is statically all-data or all-zeros."""
    s = pl.program_id(1)

    @pl.when(s < n_data_tiles)
    def _copy():
        o_ref[...] = x_ref[...]

    @pl.when(s >= n_data_tiles)
    def _zero():
        o_ref[...] = jnp.zeros_like(o_ref)


def _fullrow_pad_kernel(x_ref, o_ref, *, f_in):
    """Fallback (HW % 128 != 0): one full contiguous batch row per step."""
    # Zero-fill then overwrite the data region: the duplicated VMEM writes of
    # the data region are negligible vs. the HBM stream, and this avoids an
    # unaligned-start lane slice (robustness over micro-opt in this fallback).
    o_ref[...] = jnp.zeros_like(o_ref)
    o_ref[0, :f_in] = x_ref[0, :]


def injective_pad(x: jax.Array, pad_size: int) -> jax.Array:
    """Zero-pad the channel dimension of an NCHW tensor by `pad_size`."""
    n, c, h, w = x.shape
    if pad_size == 0:
        return x
    c_out = c + pad_size
    hw = h * w
    f_in = c * hw
    f_out = c_out * hw
    itemsize = jnp.dtype(x.dtype).itemsize
    max_block_bytes, vmem_cap = _vmem_budgets()

    x2 = x.reshape(n, f_in)
    total_bytes = (n * f_in + n * f_out) * itemsize

    if hw % 128 == 0:
        # --- Main path: flat lane-dense tiles, no masked stores. ---
        period = math.gcd(c, pad_size) * hw          # 128 | hw | period
        t = _largest_tile(period, max_block_bytes // itemsize)
        # Block multiple batch rows per step when the per-row payload is small.
        nb = 1
        for d in range(n, 0, -1):
            if n % d == 0 and d * t * itemsize <= max_block_bytes:
                nb = d
                break
        n_data_tiles = f_in // t
        n_tiles = f_out // t      # >= (c+pad)/gcd(c,pad) >= 2 -> v7x gets >=2 parallel steps

        block_bytes = nb * t * itemsize
        vmem_needed = 2 * (block_bytes + block_bytes) + (1 << 20)
        vmem_limit = min(max(vmem_needed, 16 * 1024 * 1024), vmem_cap)

        kernel = functools.partial(_flat_pad_kernel, n_data_tiles=n_data_tiles)
        out2 = pl.pallas_call(
            kernel,
            out_shape=jax.ShapeDtypeStruct((n, f_out), x.dtype),
            grid_spec=pltpu.PrefetchScalarGridSpec(
                num_scalar_prefetch=0,
                grid=(n // nb, n_tiles),
                in_specs=[
                    # Zero tiles clamp to the last data tile: same block index
                    # on consecutive steps -> Pallas skips the inbound DMA.
                    pl.BlockSpec(
                        (nb, t),
                        lambda b, s: (b, jnp.minimum(s, n_data_tiles - 1)),
                    ),
                ],
                out_specs=pl.BlockSpec((nb, t), lambda b, s: (b, s)),
            ),
            compiler_params=pltpu.CompilerParams(
                dimension_semantics=("parallel", "parallel"),
                vmem_limit_bytes=vmem_limit,
            ),
            cost_estimate=pl.CostEstimate(
                flops=0, transcendentals=0, bytes_accessed=total_bytes
            ),
        )(x2)
    else:
        # --- Fallback: full-extent lane blocks (always legal), one batch row
        # per step; each inbound/outbound DMA is a single contiguous slab. ---
        # TODO(synk): if a single (c_out*hw) row ever exceeds the VMEM budget
        # (huge C_out*HW with HW % 128 != 0), the lane axis must additionally
        # be tiled with a ragged/cdiv grid.
        vmem_needed = 2 * (f_in + f_out) * itemsize + (1 << 20)
        vmem_limit = min(max(vmem_needed, 16 * 1024 * 1024), vmem_cap)

        kernel = functools.partial(_fullrow_pad_kernel, f_in=f_in)
        out2 = pl.pallas_call(
            kernel,
            out_shape=jax.ShapeDtypeStruct((n, f_out), x.dtype),
            grid_spec=pltpu.PrefetchScalarGridSpec(
                num_scalar_prefetch=0,
                grid=(n,),
                in_specs=[pl.BlockSpec((1, f_in), lambda b: (b, 0))],
                out_specs=pl.BlockSpec((1, f_out), lambda b: (b, 0)),
            ),
            compiler_params=pltpu.CompilerParams(
                dimension_semantics=("parallel",),
                vmem_limit_bytes=vmem_limit,
            ),
            cost_estimate=pl.CostEstimate(
                flops=0, transcendentals=0, bytes_accessed=total_bytes
            ),
        )(x2)

    return out2.reshape(n, c_out, h, w)


def injective_pad_inverse(x: jax.Array, pad_size: int) -> jax.Array:
    """Inverse: drop the last `pad_size` channels (plain JAX glue)."""
    return x[:, : x.shape[1] - pad_size, :, :]


if __name__ == "__main__":
    key = jax.random.PRNGKey(0)

    # --- Main (lane-dense flat) path: HW % 128 == 0 ---
    N, C, H, W = 2, 4, 16, 16
    pad_size = 3
    x = jax.random.normal(key, (N, C, H, W), dtype=jnp.float32)

    y = jax.block_until_ready(injective_pad(x, pad_size))
    y_ref = jnp.pad(x, ((0, 0), (0, pad_size), (0, 0), (0, 0)))
    assert y.shape == (N, C + pad_size, H, W), y.shape
    assert jnp.array_equal(y, y_ref), "mismatch vs reference (flat path)"
    x_rec = injective_pad_inverse(y, pad_size)
    assert jnp.array_equal(x_rec, x), "inverse mismatch (flat path)"

    # --- Fallback path: HW not a multiple of 128 ---
    x_odd = jax.random.normal(key, (2, 3, 6, 6), dtype=jnp.float32)
    y_odd = jax.block_until_ready(injective_pad(x_odd, 2))
    y_odd_ref = jnp.pad(x_odd, ((0, 0), (0, 2), (0, 0), (0, 0)))
    assert jnp.array_equal(y_odd, y_odd_ref), "mismatch vs reference (fallback path)"

    print("KERNEL_OK")
</pallas_src>

<mosaic_0001>
module attributes {stable_mosaic.version = 11 : i64} {
  func.func @_flat_pad_kernel(%arg0: i32, %arg1: i32, %arg2: memref<2x256xf32, #tpu.memory_space<vmem>>, %arg3: memref<2x256xf32, #tpu.memory_space<vmem>>) attributes {dimension_semantics = [#tpu.dimension_semantics<parallel>, #tpu.dimension_semantics<parallel>], iteration_bounds = array<i64: 1, 7>, scalar_prefetch = 0 : i64, scratch_operands = 0 : i64, tpu.core_type = #tpu.core_type<tc>, window_params = [{transform_indices = @transform_0, window_bounds = array<i64: 2, 256>}, {transform_indices = @transform_1, window_bounds = array<i64: 2, 256>}]} {
    %c4_i32 = arith.constant 4 : i32
    %0 = arith.cmpi slt, %arg1, %c4_i32 : i32
    %1 = arith.extui %0 : i1 to i32
    %c0_i32 = arith.constant 0 : i32
    %2 = arith.cmpi ne, %1, %c0_i32 : i32
    scf.if %2 {
      %c0 = arith.constant 0 : index
      %c0_2 = arith.constant 0 : index
      %6 = vector.load %arg2[%c0, %c0_2] : memref<2x256xf32, #tpu.memory_space<vmem>>, vector<2x256xf32>
      %c0_3 = arith.constant 0 : index
      %c0_4 = arith.constant 0 : index
      %7 = vector.load %arg3[%c0_3, %c0_4] : memref<2x256xf32, #tpu.memory_space<vmem>>, vector<2x256xf32>
      tpu.vector_store %arg3[%c0_3, %c0_4], %6 {strides = array<i32>} : memref<2x256xf32, #tpu.memory_space<vmem>>, vector<2x256xf32>,
    } else {
    }
    %c4_i32_0 = arith.constant 4 : i32
    %3 = arith.cmpi sge, %arg1, %c4_i32_0 : i32
    %4 = arith.extui %3 : i1 to i32
    %c0_i32_1 = arith.constant 0 : i32
    %5 = arith.cmpi ne, %4, %c0_i32_1 : i32
    scf.if %5 {
      %cst = arith.constant 0.000000e+00 : f32
      %6 = vector.broadcast %cst : f32 to vector<2x256xf32>
      %c0 = arith.constant 0 : index
      %c0_2 = arith.constant 0 : index
      %7 = vector.load %arg3[%c0, %c0_2] : memref<2x256xf32, #tpu.memory_space<vmem>>, vector<2x256xf32>
      tpu.vector_store %arg3[%c0, %c0_2], %6 {strides = array<i32>} : memref<2x256xf32, #tpu.memory_space<vmem>>, vector<2x256xf32>,
    } else {
    }
    return
  }
  func.func @transform_0(%arg0: i32, %arg1: i32) -> (i32, i32) {
    %c3_i32 = arith.constant 3 : i32
    %0 = arith.minsi %arg1, %c3_i32 : i32
    %c0_i32 = arith.constant 0 : i32
    return %arg0, %0 : i32, i32
  }
  func.func @transform_1(%arg0: i32, %arg1: i32) -> (i32, i32) {
    %c0_i32 = arith.constant 0 : i32
    return %arg0, %arg1 : i32, i32
  }
}

</mosaic_0001>

<bundles_post_ra>
// kernel: tpu_custom_call.1
= control target key start
LH: loop header
LB: loop body
LE: loop exit
PB: predicated region body
PF: predicated region fallthrough
CT: control target
= control target key end

     0   :  { %6 = vsyncpa [#allocation3], 0  ;;  %s724_s0 = inlined_call_operand.hbm [shape: f32[2,1024], index: 0, kind: input, shape index: {}]   ;;  %s725_s1 = inlined_call_operand.hbm [shape: f32[2,1792], index: 1, kind: output, shape index: {}]  }
   0x1   :  { %8 = vsyncpa [#allocation3 + $0x1], 0 }
   0x2   :  { %9 = vsyncpa [#allocation4], 0 }
   0x3   :  { %11 = vsyncpa [#allocation4 + $0x1], 0  ;;  %s530_s6 = smov 0   ;;  %s532_s7 = smov 0  }
   0x4   :  { %s534_s8 = smov 0   ;;  %s536_s9 = smov 0  }
   0x5   :  { %s538_s10 = smov 0   ;;  %s540_s11 = smov 0  }
   0x6   :  { %s542_s12 = smov 0   ;;  %s544_s13 = smov 0  }
   0x7   :  { %s546_s14 = smov 0  }
   0x8 LB: > { %s273_s15 = sadd.s32 4294967295, %s515_s14   ;;  %s274_s16 = sadd.s32 4294967294, %s515_s14   ;;  %s515_s14 = sphi %s546_s14, %s17_s14   ;;  %s511_s13 = sphi %s544_s13, %s743_s13   ;;  %s507_s12 = sphi %s542_s12, %s742_s12   ;;  %s503_s11 = sphi %s540_s11, %s741_s11   ;;  %s499_s10 = sphi %s538_s10, %s740_s10   ;;  %s495_s9 = sphi %s536_s9, %s739_s9   ;;  %s491_s8 = sphi %s534_s8, %s738_s8   ;;  %s487_s7 = sphi %s532_s7, %s737_s7   ;;  %s483_s6 = sphi %s530_s6, %s736_s6  }
   0x9   : > { %s26_s17 = sadd.s32 1, %s511_s13  ;;  %p33_p0 = scmp.lt.s32.totalorder %s511_s13, 3 }
   0xa   : > { %p27_p1 = scmp.ge.s32.totalorder %s26_s17, 7  ;;  %s42_s18 = sadd.s32 1, %s503_s11 }
   0xb   : > { %s34_s19 = scalar_select %p33_p0, %s511_s13, 3 }
   0xc   : > { %s745_s17 = smov (%p27_p1, %s26_s17), 0  ;;  %p49_p2 = scmp.ne.s32.totalorder %s503_s11, %s499_s10 }
   0xd   : > { %p50_p3 = scmp.eq.s32.totalorder %s515_s14, 0  ;;  %p35_p4 = scmp.lt.s32.totalorder %s745_s17, 3 }
   0xe   : > { %p55_p5 = scmp.ne.s32.totalorder %s499_s10, %s495_s9  ;;  %p56_p7 = scmp.eq.s32.totalorder %s273_s15, 0 }
   0xf   : > { %p586_p6 = por %p50_p3, %p49_p2  ;;  %s66_s23 = ssub.s32 %s511_s13, %s745_s17 }
  0x10   : > { %s36_s21 = scalar_select %p35_p4, %s745_s17, 3 }
  0x11   : > { %p591_p8 = por %p56_p7, %p55_p5  ;;  %p68_p9 = scmp.eq.s32.totalorder %s66_s23, 0 }
  0x12   : > { %s38_s24 = ssub.s32 %s34_s19, %s36_s21  ;;  %s70_s25 = sadd.s32 1, %s491_s8 }
  0x13   : > { %p40_p10 = scmp.eq.s32.totalorder %s38_s24, 0  ;;  %p80_p11 = scmp.ne.s32.totalorder %s491_s8, %s487_s7 }
  0x14   : > { %s599_s26 = scalar_select %p68_p9, %s491_s8, %s70_s25  }
  0x15   : > { %s602_s27 = scalar_select %p40_p10, %s503_s11, %s42_s18  }
  0x16   : > { %p81_p12 = scmp.eq.s32.totalorder %s273_s15, 6  ;;  %p86_p13 = scmp.ne.s32.totalorder %s487_s7, %s483_s6 }
  0x17   : > { %p87_p0 = scmp.eq.s32.totalorder %s274_s16, 6  ;;  %p304_p3 = scmp.lt.s32.totalorder %s515_s14, 7 }
  0x18   : > { %p608_p1 = por %p81_p12, %p80_p11  ;;  %s107_s30 = sand.u32 1, %s503_s11  }
  0x19   : > { %p612_p2 = por %p87_p0, %p86_p13  ;;  %s290_s2 = sshll.u32 %s34_s19, 6 }
  0x1a   : > { %s729_s28 = scalar_select %p608_p1, 1, 0 }
  0x1b   : > { %s730_s29 = scalar_select %p612_p2, 1, 0 }
  0x1c   : > { %s277_s3 = sshll.u32 %s107_s30, 2  ;;  %s621_s9 = scalar_lea.hbm %s724_s0, %s290_s2 }
  0x1d   : > { %s111_s15 = scalar_lea.vmem [#allocation2], %s277_s3  ;;  %p625_p4 = pnand %p304_p3, %p586_p6 }
  0x1e   : > { %s123_s16 = sshll.u32 %s111_s15, 4  ;;  %s108_s19 = scalar_lea.sflag [#allocation3], %s107_s30  ;;  %s629_s16 = int_to_ptr.vmem [resolvable:$true] %s123_s16 }
  0x1f   : > { %s379_s21 = scalar_lea.hbm %s621_s9, 64  ;;  %p381_p10 = pneg %p625_p4 }
  0x20   : > { %p380_p9 = scmp.ne.s32.totalorder %s621_s9, %s379_s21  ;;  %s384_s24 = scalar_lea.hbm %s724_s0, 256 }
  0x21   : > { %p385_p6 = scmp.lt.u32.totalorder %s621_s9, %s724_s0  ;;  %p386_p13 = scmp.lt.u32.totalorder %s384_s24, %s379_s21 }
  0x22   : > { %p382_p11 = pnand %p381_p10, %p380_p9  ;;  %p388_p3 = scmp.lt.u32.totalorder %s379_s21, %s621_s9 }
  0x23   : > { %p387_p0 = por %p386_p13, %p385_p6 }
  0x24   : > { %p383_p12 = pneg %p382_p11 }
  0x25   : > { %p389_p5 = por %p388_p3, %p387_p0 }
  0x27   : > { %p390_p7 = pnand %p389_p5, %p383_p12 }
  0x29   : > { %393 = shalt.err (!%p390_p7)
}
  0x2a   : > { %s394_s30 = scalar_lea.vmem %s629_s16, 64  ;;  %s517_s3 = smov [#allocation2]  }
  0x2b   : > { %p395_p9 = scmp.ne.s32.totalorder %s629_s16, %s394_s30  ;;  %s399_s4 = sshll.u32 %s517_s3, 4  ;;  %s400_s4 = int_to_ptr.vmem [resolvable:$false] %s399_s4 }
  0x2c   : > { %s401_s5 = scalar_lea.vmem %s400_s4, 128  ;;  %p402_p1 = scmp.lt.s32.totalorder %s629_s16, %s400_s4 }
  0x2d   : > { %p397_p11 = pnand %p395_p9, %p381_p10  ;;  %p403_p6 = scmp.lt.s32.totalorder %s401_s5, %s394_s30 }
  0x2f   : > { %p398_p2 = pneg %p397_p11  ;;  %p404_p13 = por %p403_p6, %p402_p1 }
  0x31   : > { %p405_p0 = pnand %p404_p13, %p398_p2 }
  0x33   : > { %408 = shalt.err (!%p405_p0)
}
  0x34   : > { %299 = dma.hbm_to_vmem [thread:$0]  (!%p625_p4), %s621_s9, 64, %s629_s16, %s108_s19  }
  0x35   : > { %p732_p5 = scmp.lt.s32.totalorder %s515_s14, 8  ;;  %p733_p7 = scmp.ge.s32.totalorder %s515_s14, 1 }
  0x37   : > { %p129_p10 = pnand %p733_p7, %p732_p5 }
  0x38   : > { %s134_s15 = sand.u32 (!%p129_p10), 1, %s499_s10  }
  0x39   : > { %132 = sbr.rel (%p129_p10) target bundleno = 108 (0x6c), region = 24  ;;  %s281_s21 = sshll.u32 (!%p129_p10), %s134_s15, 2 }
  0x3a   : > { %s135_s20 = scalar_lea.sflag (!%p129_p10), [#allocation3], %s134_s15  ;;  %s138_s23 = scalar_lea.vmem (!%p129_p10), [#allocation2], %s281_s21 }
  0x40   : > { %474 = dma.done.wait (%p591_p8), %s135_s20, 64  }
  0x41   : > { %476 = vsyncadd (%p591_p8), %s135_s20, 4294967232  ;;  %s154_s18 = sand.u32 1, %s487_s7   ;;  %p283_p1 = scmp.ge.s32.totalorder %s507_s12, 4 }
  0x42   : > { %s282_s24 = sshll.u32 %s154_s18, 2  ;;  %v165_v0 = vld [vmem:[%s138_s23] sm:$0xf] (!%p283_p1) }
  0x43   : > { %s156_s25 = scalar_lea.vmem [#allocation5], %s282_s24  ;;  %164 = sbr.rel (%p283_p1) target bundleno = 74 (0x4a), region = 32 }
  0x44   : > { %166 = vst [vmem:[%s156_s25] sm:$0xf] (!%p283_p1), %v165_v0 }
  0x4a PF: > { %p284_p2 = scmp.lt.s32.totalorder %s507_s12, 4 }
  0x4b   : > { %v518_v1 = vmov (!%p284_p2), 0.0  }
  0x4c   : > { %170 = sbr.rel (%p284_p2) target bundleno = 83 (0x53), region = 36  ;;  %171 = vst [vmem:[%s156_s25] sm:$0xf] (!%p284_p2), %v518_v1 }
  0x53 PF: > { %s291_s22 = sshll.u32 %s507_s12, 6  ;;  %s189_s2 = sshll.u32 %s156_s25, 4  ;;  %s190_s2 = int_to_ptr.vmem [resolvable:$true] %s189_s2 }
  0x54   : > { %s674_s19 = scalar_lea.hbm %s725_s1, %s291_s22  ;;  %s173_s30 = scalar_lea.sflag [#allocation4], %s154_s18 }
  0x55   : > { %s409_s3 = scalar_lea.vmem %s190_s2, 64  ;;  %p734_p4 = scmp.ne.s32.totalorder %s729_s28, 0 }
  0x56   : > { %p410_p8 = scmp.ne.s32.totalorder %s190_s2, %s409_s3  ;;  %s519_s4 = smov [#allocation5]  }
  0x57   : > { %s413_s5 = sshll.u32 %s519_s4, 4  ;;  %s414_s5 = int_to_ptr.vmem [resolvable:$false] %s413_s5 }
  0x58   : > { %p411_p12 = pnand %p410_p8, %p734_p4  ;;  %s415_s15 = scalar_lea.vmem %s414_s5, 128 }
  0x59   : > { %p416_p9 = scmp.lt.s32.totalorder %s190_s2, %s414_s5  ;;  %p417_p11 = scmp.lt.s32.totalorder %s415_s15, %s409_s3 }
  0x5a   : > { %p412_p3 = pneg %p411_p12 }
  0x5b   : > { %p418_p6 = por %p417_p11, %p416_p9 }
  0x5d   : > { %p419_p13 = pnand %p418_p6, %p412_p3 }
  0x5f   : > { %422 = shalt.err (!%p419_p13)
}
  0x60   : > { %s423_s12 = scalar_lea.hbm %s674_s19, 64  ;;  %s427_s23 = scalar_lea.hbm %s725_s1, 448 }
  0x61   : > { %p424_p0 = scmp.ne.s32.totalorder %s674_s19, %s423_s12  ;;  %p428_p10 = scmp.lt.u32.totalorder %s674_s19, %s725_s1 }
  0x62   : > { %p429_p1 = scmp.lt.u32.totalorder %s427_s23, %s423_s12  ;;  %p431_p8 = scmp.lt.u32.totalorder %s423_s12, %s674_s19 }
  0x63   : > { %p425_p5 = pnand %p424_p0, %p734_p4 }
  0x64   : > { %p430_p2 = por %p429_p1, %p428_p10 }
  0x65   : > { %p426_p7 = pneg %p425_p5 }
  0x66   : > { %p432_p12 = por %p431_p8, %p430_p2 }
  0x68   : > { %p433_p3 = pnand %p432_p12, %p426_p7 }
  0x6a   : > { %436 = shalt.err (!%p433_p3)
}
  0x6b   : > { %294 = dma.vmem_to_hbm [thread:$0]  (%p734_p4), %s190_s2, 64, %s674_s19, %s173_s30  }
  0x6c PF: > { %p305_p9 = scmp.ge.s32.totalorder %s515_s14, 2  ;;  %s201_s25 = sand.u32 1, %s483_s6  }
  0x6d   : > { %p735_p11 = scmp.ne.s32.totalorder %s730_s29, 0  ;;  %s202_s22 = scalar_lea.sflag [#allocation4], %s201_s25 }
  0x6f   : > { %p301_p6 = pnand %p305_p9, %p735_p11 }
  0x71   : > { %478 = dma.done.wait (!%p301_p6), %s202_s22, 64  }
  0x72   : > { %480 = vsyncadd (!%p301_p6), %s202_s22, 4294967232  ;;  %s17_s14 = sadd.s32 1, %s515_s14   ;;  %s736_s6 = smov %s487_s7 }
  0x73   : > { %p14_p13 = scmp.ge.s32.totalorder %s17_s14, 9   ;;  %s737_s7 = smov %s491_s8 }
  0x74   : > { %s738_s8 = smov %s599_s26  ;;  %s739_s9 = smov %s499_s10 }
  0x75   : > { %s740_s10 = smov %s503_s11  ;;  %s741_s11 = smov %s602_s27 }
  0x76   : > { %s742_s12 = smov %s511_s13  ;;  %s743_s13 = smov %s745_s17 }
  0x77   :  { %16 = sbr.rel (!%p14_p13) target bundleno = 8 (0x8), region = 77 }
  0x7e   :  { %207 = vsyncpa [#allocation3], 1 }
  0x7f   :  { %209 = vsyncpa [#allocation3 + $0x1], 1 }
  0x80   :  { %210 = vsyncpa [#allocation4], 1 }
  0x81   :  { %212 = vsyncpa [#allocation4 + $0x1], 1 }

</bundles_post_ra>
